<compile_context>
chip_gen: v7x
topology: tpu7x:2x2x1
jax: 0.10.0
libtpu: 0.0.40
codegen_flags: <defaults>
</compile_context>

<pallas_src>
import math

import jax
import jax.numpy as jnp
from jax.experimental import pallas as pl
from jax.experimental.pallas import tpu as pltpu


# ----------------------------------------------------------------------------
# helpers
# ----------------------------------------------------------------------------
def _round_up(x, m):
    return ((x + m - 1) // m) * m


def _pad2d(a, rows, cols):
    r, c = a.shape
    if r == rows and c == cols:
        return a
    return jnp.pad(a, ((0, rows - r), (0, cols - c)))


# ----------------------------------------------------------------------------
# tiled linear kernel:  out = activation(dropout(x) @ W + b)
# ----------------------------------------------------------------------------
def _make_linear_kernel(apply_dropout, keep_threshold, inv_keep, has_bias,
                        activation):
    """Kernel body specialized for (dropout?, bias?, activation)."""

    def kernel(*refs):
        refs = list(refs)
        bits_ref = refs.pop(0) if apply_dropout else None
        x_ref = refs.pop(0)
        w_ref = refs.pop(0)
        b_ref = refs.pop(0) if has_bias else None
        o_ref = refs.pop(0)
        acc_ref = refs.pop(0)

        k = pl.program_id(2)

        @pl.when(k == 0)
        def _():
            acc_ref[...] = jnp.zeros_like(acc_ref)

        x = x_ref[...]
        if apply_dropout:
            # integer-threshold inverted dropout: keep iff bits < keep_prob*2^32
            keep = bits_ref[...] < jnp.uint32(keep_threshold)
            x = jnp.where(keep, x * jnp.asarray(inv_keep, x.dtype),
                          jnp.zeros((), x.dtype))

        # native-dtype MXU feed; f32 accumulation.
        acc_ref[...] += jnp.dot(x, w_ref[...],
                                preferred_element_type=jnp.float32)

        @pl.when(k == pl.num_programs(2) - 1)
        def _():
            out = acc_ref[...]
            if has_bias:
                out = out + b_ref[...].astype(jnp.float32)
            if activation == "relu":
                out = jnp.maximum(out, 0.0)
            o_ref[...] = out.astype(o_ref.dtype)

    return kernel


def linear_forward(x, weight, bias=None, *, dropout=0.0, training=False,
                   key=None, activation=None, tm=None, tn=None, tk=None):
    """Pallas equivalent of Linear.forward (optionally fused with ReLU).

    x: (M, K), weight: (K, N), bias: optional (N,)
    """
    M, K = x.shape
    K2, N = weight.shape
    assert K == K2, "in_features mismatch"
    out_dtype = x.dtype
    itemsize = jnp.dtype(x.dtype).itemsize

    apply_dropout = bool(training) and float(dropout) > 0.0
    keep_prob = 1.0 - float(dropout)
    if apply_dropout and key is None:
        raise ValueError("training-mode dropout requires a PRNG key")
    has_bias = bias is not None

    # Tile sizes: biggest reasonable tiles that respect the (8,128) layout and
    # stay well inside the smallest scoped-VMEM budget (v5e 16 MiB default).
    tm = tm or min(_round_up(M, 8), 256)
    tn = tn or min(_round_up(N, 128), 256)
    tk = tk or min(_round_up(K, 128), 512)

    Mp, Kp, Np = _round_up(M, tm), _round_up(K, tk), _round_up(N, tn)

    xp = _pad2d(x, Mp, Kp)
    wp = _pad2d(weight, Kp, Np)

    inputs, in_specs = [], []
    if apply_dropout:
        bits = jax.random.bits(key, (Mp, Kp), dtype=jnp.uint32)
        inputs.append(bits)
        in_specs.append(pl.BlockSpec((tm, tk), lambda i, j, k: (i, k)))
    inputs += [xp, wp]
    in_specs += [pl.BlockSpec((tm, tk), lambda i, j, k: (i, k)),
                 pl.BlockSpec((tk, tn), lambda i, j, k: (k, j))]
    if has_bias:
        bp = jnp.pad(bias, (0, Np - N)).reshape(1, Np)
        inputs.append(bp)
        in_specs.append(pl.BlockSpec((1, tn), lambda i, j, k: (0, j)))

    keep_threshold = min(int(round(keep_prob * (1 << 32))), (1 << 32) - 1)
    inv_keep = (1.0 / keep_prob) if keep_prob > 0.0 else 0.0

    kernel = _make_linear_kernel(apply_dropout, keep_threshold, inv_keep,
                                 has_bias, activation)

    grid = (Mp // tm, Np // tn, Kp // tk)

    # VMEM sizing: double-buffered streamed tiles + output + accumulator.
    tile_bytes = (2 * (tm * tk + tk * tn) * itemsize
                  + (2 * tm * tk * 4 if apply_dropout else 0)
                  + 2 * tm * tn * itemsize + tm * tn * 4)
    vmem_limit = int(min(64 * 1024 * 1024,
                         max(16 * 1024 * 1024, 4 * tile_bytes)))

    cost = pl.CostEstimate(
        flops=2 * Mp * Np * Kp,
        transcendentals=0,
        bytes_accessed=(Mp * Kp + Kp * Np + Mp * Np) * itemsize)

    f = pl.pallas_call(
        kernel,
        out_shape=jax.ShapeDtypeStruct((Mp, Np), out_dtype),
        grid_spec=pltpu.PrefetchScalarGridSpec(
            num_scalar_prefetch=0,
            grid=grid,
            in_specs=in_specs,
            out_specs=pl.BlockSpec((tm, tn), lambda i, j, k: (i, j)),
            scratch_shapes=[pltpu.VMEM((tm, tn), jnp.float32)]),
        compiler_params=pltpu.CompilerParams(
            dimension_semantics=("parallel", "parallel", "arbitrary"),
            vmem_limit_bytes=vmem_limit),
        cost_estimate=cost,
    )
    out = f(*inputs)
    return out[:M, :N]


# ----------------------------------------------------------------------------
# row-tiled log_softmax over the last dim
# ----------------------------------------------------------------------------
def _log_softmax_kernel(x_ref, o_ref):
    x = x_ref[...].astype(jnp.float32)
    m = jnp.max(x, axis=-1, keepdims=True)
    s = x - m
    lse = jnp.log(jnp.sum(jnp.exp(s), axis=-1, keepdims=True))
    o_ref[...] = (s - lse).astype(o_ref.dtype)


def log_softmax(x, *, tm=128):
    M, N = x.shape
    tm = min(_round_up(M, 8), tm)
    Mp = _round_up(M, tm)
    xp = _pad2d(x, Mp, N)
    out = pl.pallas_call(
        _log_softmax_kernel,
        out_shape=jax.ShapeDtypeStruct((Mp, N), x.dtype),
        grid_spec=pltpu.PrefetchScalarGridSpec(
            num_scalar_prefetch=0,
            grid=(Mp // tm,),
            in_specs=[pl.BlockSpec((tm, N), lambda i: (i, 0))],
            out_specs=pl.BlockSpec((tm, N), lambda i: (i, 0))),
        compiler_params=pltpu.CompilerParams(
            dimension_semantics=("parallel",)),
    )(xp)
    return out[:M]


# ----------------------------------------------------------------------------
# LPGraph parameters + forward
# ----------------------------------------------------------------------------
def init_linear_params(key, in_features, out_features, bias=False):
    """Mirrors Linear.reset_parameters():
    kaiming_uniform_(mode='fan_out', a=sqrt(5)) on (in, out)  ->  U(-1/sqrt(in), 1/sqrt(in));
    bias ~ U(-1/sqrt(out), 1/sqrt(out))."""
    kw, kb = jax.random.split(key)
    bound = 1.0 / math.sqrt(in_features)
    weight = jax.random.uniform(kw, (in_features, out_features),
                                dtype=jnp.float32, minval=-bound, maxval=bound)
    b = None
    if bias:
        stdv = 1.0 / math.sqrt(out_features)
        b = jax.random.uniform(kb, (out_features,), dtype=jnp.float32,
                               minval=-stdv, maxval=stdv)
    return weight, b


def init_lpgraph_params(key, nfeat, nhid, nclass):
    k_enc, k_pred = jax.random.split(key)
    w_enc, b_enc = init_linear_params(k_enc, nfeat, nhid, bias=True)
    w_pred, b_pred = init_linear_params(k_pred, nhid, nclass, bias=True)
    return dict(w_enc=w_enc, b_enc=b_enc, w_pred=w_pred, b_pred=b_pred)


def lpgraph_forward(x, params, *, dropout, training=False, key=None):
    """LPGraph.forward: (relu(encoder(x)), log_softmax(predictor(relu(...))))."""
    if training and dropout > 0.0:
        k_enc, k_pred = jax.random.split(key)
    else:
        k_enc = k_pred = None
    h = linear_forward(x, params["w_enc"], params["b_enc"],
                       dropout=dropout, training=training, key=k_enc,
                       activation="relu")
    logits = linear_forward(h, params["w_pred"], params["b_pred"],
                            dropout=dropout, training=training, key=k_pred)
    return h, log_softmax(logits)


# ----------------------------------------------------------------------------
# demo / self-check
# ----------------------------------------------------------------------------
if __name__ == "__main__":
    key = jax.random.PRNGKey(0)
    k_x, k_p, k_drop = jax.random.split(key, 3)

    # small graph-ish shapes (exercises >1 tile along M, N and K)
    num_nodes, nfeat, nhid, nclass = 256, 384, 256, 16
    dropout_p = 0.5

    x = jax.random.normal(k_x, (num_nodes, nfeat), dtype=jnp.float32)
    params = init_lpgraph_params(k_p, nfeat, nhid, nclass)

    # --- eval mode (dropout is identity): compare against pure-JAX reference ---
    h, logp = lpgraph_forward(x, params, dropout=dropout_p, training=False)
    h = jax.block_until_ready(h)
    logp = jax.block_until_ready(logp)

    ref_h = jnp.maximum(x @ params["w_enc"] + params["b_enc"], 0.0)
    ref_logp = jax.nn.log_softmax(ref_h @ params["w_pred"] + params["b_pred"],
                                  axis=-1)
    assert h.shape == (num_nodes, nhid) and logp.shape == (num_nodes, nclass)
    assert jnp.allclose(h, ref_h, atol=1e-3, rtol=1e-3), "encoder mismatch"
    assert jnp.allclose(logp, ref_logp, atol=1e-3, rtol=1e-3), "log_softmax mismatch"

    # --- training mode: exercise the in-kernel dropout path ---
    h_t, logp_t = lpgraph_forward(x, params, dropout=dropout_p, training=True,
                                  key=k_drop)
    h_t = jax.block_until_ready(h_t)
    logp_t = jax.block_until_ready(logp_t)
    assert h_t.shape == (num_nodes, nhid) and logp_t.shape == (num_nodes, nclass)
    assert bool(jnp.all(jnp.isfinite(logp_t)))

    print("KERNEL_OK")
</pallas_src>

<mosaic_0001>
module attributes {stable_mosaic.version = 11 : i64} {
  func.func @kernel(%arg0: i32, %arg1: i32, %arg2: i32, %arg3: memref<256x384xf32, #tpu.memory_space<vmem>>, %arg4: memref<384x256xf32, #tpu.memory_space<vmem>>, %arg5: memref<1x256xf32, #tpu.memory_space<vmem>>, %arg6: memref<256x256xf32, #tpu.memory_space<vmem>>, %arg7: memref<256x256xf32, #tpu.memory_space<vmem>>) attributes {dimension_semantics = [#tpu.dimension_semantics<parallel>, #tpu.dimension_semantics<parallel>, #tpu.dimension_semantics<arbitrary>], iteration_bounds = array<i64: 1, 1, 1>, scalar_prefetch = 0 : i64, scratch_operands = 1 : i64, tpu.core_type = #tpu.core_type<tc>, window_params = [{transform_indices = @transform_0, window_bounds = array<i64: 256, 384>}, {transform_indices = @transform_1, window_bounds = array<i64: 384, 256>}, {transform_indices = @transform_2, window_bounds = array<i64: 1, 256>}, {transform_indices = @transform_3, window_bounds = array<i64: 256, 256>}]} {
    %c0_i32 = arith.constant 0 : i32
    %0 = arith.cmpi eq, %arg2, %c0_i32 : i32
    %1 = arith.extui %0 : i1 to i32
    %c0_i32_0 = arith.constant 0 : i32
    %2 = arith.cmpi ne, %1, %c0_i32_0 : i32
    scf.if %2 {
      %cst_10 = arith.constant 0.000000e+00 : f32
      %12 = vector.broadcast %cst_10 : f32 to vector<256x256xf32>
      %c0_11 = arith.constant 0 : index
      %c0_12 = arith.constant 0 : index
      %13 = vector.load %arg7[%c0_11, %c0_12] : memref<256x256xf32, #tpu.memory_space<vmem>>, vector<256x256xf32>
      tpu.vector_store %arg7[%c0_11, %c0_12], %12 {strides = array<i32>} : memref<256x256xf32, #tpu.memory_space<vmem>>, vector<256x256xf32>,
    } else {
    }
    %c0 = arith.constant 0 : index
    %c0_1 = arith.constant 0 : index
    %3 = vector.load %arg3[%c0, %c0_1] : memref<256x384xf32, #tpu.memory_space<vmem>>, vector<256x384xf32>
    %c0_2 = arith.constant 0 : index
    %c0_3 = arith.constant 0 : index
    %4 = vector.load %arg7[%c0_2, %c0_3] : memref<256x256xf32, #tpu.memory_space<vmem>>, vector<256x256xf32>
    %c0_4 = arith.constant 0 : index
    %c0_5 = arith.constant 0 : index
    %5 = vector.load %arg4[%c0_4, %c0_5] : memref<384x256xf32, #tpu.memory_space<vmem>>, vector<384x256xf32>
    %cst = arith.constant dense<0.000000e+00> : vector<256x256xf32>
    %6 = tpu.matmul %3, %5, %cst {dimension_numbers = #tpu.dot_dimension_numbers<[1], [0], [0], [1], [0, 0, 1, 1], [], []>} : vector<256x384xf32>, vector<384x256xf32>, vector<256x256xf32> -> vector<256x256xf32>
    %7 = arith.addf %4, %6 : vector<256x256xf32>
    %c0_6 = arith.constant 0 : index
    %c0_7 = arith.constant 0 : index
    %8 = vector.load %arg7[%c0_6, %c0_7] : memref<256x256xf32, #tpu.memory_space<vmem>>, vector<256x256xf32>
    tpu.vector_store %arg7[%c0_6, %c0_7], %7 {strides = array<i32>} : memref<256x256xf32, #tpu.memory_space<vmem>>, vector<256x256xf32>,
    %c0_i32_8 = arith.constant 0 : i32
    %9 = arith.cmpi eq, %arg2, %c0_i32_8 : i32
    %10 = arith.extui %9 : i1 to i32
    %c0_i32_9 = arith.constant 0 : i32
    %11 = arith.cmpi ne, %10, %c0_i32_9 : i32
    scf.if %11 {
      %c0_10 = arith.constant 0 : index
      %c0_11 = arith.constant 0 : index
      %12 = vector.load %arg7[%c0_10, %c0_11] : memref<256x256xf32, #tpu.memory_space<vmem>>, vector<256x256xf32>
      %c0_12 = arith.constant 0 : index
      %c0_13 = arith.constant 0 : index
      %13 = vector.load %arg5[%c0_12, %c0_13] : memref<1x256xf32, #tpu.memory_space<vmem>>, vector<1x256xf32>
      %14 = vector.broadcast %13 : vector<1x256xf32> to vector<256x256xf32>
      %15 = arith.addf %12, %14 : vector<256x256xf32>
      %cst_14 = arith.constant 0.000000e+00 : f32
      %16 = vector.broadcast %cst_14 : f32 to vector<256x256xf32>
      %17 = arith.maximumf %15, %16 : vector<256x256xf32>
      %c0_15 = arith.constant 0 : index
      %c0_16 = arith.constant 0 : index
      %18 = vector.load %arg6[%c0_15, %c0_16] : memref<256x256xf32, #tpu.memory_space<vmem>>, vector<256x256xf32>
      tpu.vector_store %arg6[%c0_15, %c0_16], %17 {strides = array<i32>} : memref<256x256xf32, #tpu.memory_space<vmem>>, vector<256x256xf32>,
    } else {
    }
    return
  }
  func.func @transform_0(%arg0: i32, %arg1: i32, %arg2: i32) -> (i32, i32) {
    %c0_i32 = arith.constant 0 : i32
    return %arg0, %arg2 : i32, i32
  }
  func.func @transform_1(%arg0: i32, %arg1: i32, %arg2: i32) -> (i32, i32) {
    %c0_i32 = arith.constant 0 : i32
    return %arg2, %arg1 : i32, i32
  }
  func.func @transform_2(%arg0: i32, %arg1: i32, %arg2: i32) -> (i32, i32) {
    %c0_i32 = arith.constant 0 : i32
    %c0_i32_0 = arith.constant 0 : i32
    return %c0_i32, %arg1 : i32, i32
  }
  func.func @transform_3(%arg0: i32, %arg1: i32, %arg2: i32) -> (i32, i32) {
    %c0_i32 = arith.constant 0 : i32
    return %arg0, %arg1 : i32, i32
  }
}

</mosaic_0001>

<bundles_post_ra>
// kernel: tpu_custom_call.1
= control target key start
LH: loop header
LB: loop body
LE: loop exit
PB: predicated region body
PF: predicated region fallthrough
CT: control target
= control target key end

     0   :  { %8 = vsyncpa [#allocation4], 0  ;;  %s1843_s0 = inlined_call_operand.hbm [shape: f32[256,384], index: 0, kind: input, shape index: {}]   ;;  %s1844_s1 = inlined_call_operand.hbm [shape: f32[384,256], index: 1, kind: input, shape index: {}]   ;;  %s1845_s2 = inlined_call_operand.vmem [shape: f32[1,256], index: 2, kind: input, shape index: {}]   ;;  %s1846_s3 = inlined_call_operand.hbm [shape: f32[256,256], index: 3, kind: output, shape index: {}]  }
   0x1   :  { %9 = vsyncpa [#allocation7], 0 }
   0x2   :  { %10 = vsyncpa [#allocation5], 0  ;;  %s1538_s12 = smov [#allocation3]   ;;  %s1466_s16 = scalar_lea.hbm %s1843_s0, 12288 }
   0x3   :  { %s16_s13 = sshll.u32 %s1538_s12, 4  ;;  %p1467_p0 = scmp.ne.s32.totalorder %s1843_s0, %s1466_s16  ;;  %s17_s13 = int_to_ptr.vmem [resolvable:$true] %s16_s13 }
   0x4   :  { %p1470_p1 = scmp.lt.u32.totalorder %s1466_s16, %s1843_s0 }
   0x6   :  { %p1472_p2 = pnand %p1470_p1, %p1467_p0 }
   0x8   :  { %1475 = shalt.err (!%p1472_p2)
}
   0x9   :  { %s1476_s21 = scalar_lea.vmem %s17_s13, 12288  ;;  %p1481_p4 = scmp.lt.s32.totalorder %s17_s13, %s17_s13 }
   0xa   :  { %p1477_p3 = scmp.ne.s32.totalorder %s17_s13, %s1476_s21  ;;  %p1482_p5 = scmp.lt.s32.totalorder %s1476_s21, %s1476_s21 }
   0xc   :  { %p1483_p6 = por %p1482_p5, %p1481_p4 }
   0xe   :  { %p1484_p7 = pnand %p1483_p6, %p1477_p3 }
  0x10   :  { %1487 = shalt.err (!%p1484_p7)
}
  0x11   :  { %s1539_s22 = smov 384   ;;  %s1540_s23 = smov 24  }
  0x12   :  { %22 = dma.hbm_to_vmem [thread:$0]  %s1843_s0, 12288, %s17_s13, [#allocation4], %s1539_s22, %s1539_s22, %s1540_s23  }
  0x13   :  { %s1541_s26 = smov [#allocation6]   ;;  %s1488_s30 = scalar_lea.hbm %s1844_s1, 12288 }
  0x14   :  { %s28_s27 = sshll.u32 %s1541_s26, 4  ;;  %p1489_p8 = scmp.ne.s32.totalorder %s1844_s1, %s1488_s30  ;;  %s29_s27 = int_to_ptr.vmem [resolvable:$true] %s28_s27 }
  0x15   :  { %p1492_p9 = scmp.lt.u32.totalorder %s1488_s30, %s1844_s1 }
  0x17   :  { %p1494_p10 = pnand %p1492_p9, %p1489_p8 }
  0x19   :  { %1497 = shalt.err (!%p1494_p10)
}
  0x1a   :  { %s1498_s8 = scalar_lea.vmem %s29_s27, 12288  ;;  %p1503_p12 = scmp.lt.s32.totalorder %s29_s27, %s29_s27 }
  0x1b   :  { %p1499_p11 = scmp.ne.s32.totalorder %s29_s27, %s1498_s8  ;;  %p1504_p13 = scmp.lt.s32.totalorder %s1498_s8, %s1498_s8 }
  0x1d   :  { %p1505_p0 = por %p1504_p13, %p1503_p12 }
  0x1f   :  { %p1506_p1 = pnand %p1505_p0, %p1499_p11 }
  0x21   :  { %1509 = shalt.err (!%p1506_p1)
}
  0x22   :  { %s1542_s0 = smov 256   ;;  %s1543_s9 = smov 16  }
  0x23   :  { %34 = dma.hbm_to_vmem [thread:$0]  %s1844_s1, 12288, %s29_s27, [#allocation7], %s1542_s0, %s1542_s0, %s1543_s9  }
  0x24   :  { %1532 = dma.done.wait [#allocation4], 12288  }
  0x25   :  { %1533 = vsyncadd [#allocation4], 4294955008 }
  0x26   :  { %1534 = dma.done.wait [#allocation7], 12288  }
  0x27   :  { %1535 = vsyncadd [#allocation7], 4294955008  ;;  %v1544_v0 = vmov 0.0   ;;  %v272_v1 = vld [vmem:[#allocation6 + $0x8] sm:$0xff]  ;;  %v274_v2 = vld [vmem:[#allocation6 + $0x18] sm:$0xff] }
  0x28   :  { %688 = vmatprep.mubr.f32.mxu0 %v1544_v0  ;;  %v271_v3 = vld [vmem:[#allocation6] sm:$0xff]  ;;  %v1298_v4 = vpack.c.bf16 %v274_v2, %v272_v1  ;;  %v273_v5 = vld [vmem:[#allocation6 + $0x10] sm:$0xff]  ;;  %v276_v6 = vld [vmem:[#allocation6 + $0x28] sm:$0xff] }
  0x29   :  { %v278_v7 = vld [vmem:[#allocation6 + $0x38] sm:$0xff]  ;;  %v1300_v8 = vpack.c.bf16 %v273_v5, %v271_v3  ;;  %v275_v10 = vld [vmem:[#allocation6 + $0x20] sm:$0xff]  ;;  %v277_v11 = vld [vmem:[#allocation6 + $0x30] sm:$0xff] }
  0x2a   :  { %v1302_v9 = vpack.c.bf16 %v278_v7, %v276_v6  ;;  %v280_v12 = vld [vmem:[#allocation6 + $0x48] sm:$0xff]  ;;  %1299 = vmatprep.subr.bf16.mxu1 %v1298_v4  ;;  %v282_v13 = vld [vmem:[#allocation6 + $0x58] sm:$0xff]  ;;  %v1304_v14 = vpack.c.bf16 %v277_v11, %v275_v10  ;;  %v279_v16 = vld [vmem:[#allocation6 + $0x40] sm:$0xff] }
  0x2b   :  { %1301 = vmatpush1.bf16.msra.mxu1 %v1300_v8  ;;  %v1306_v15 = vpack.c.bf16 %v282_v13, %v280_v12  ;;  %v281_v17 = vld [vmem:[#allocation6 + $0x50] sm:$0xff]  ;;  %v284_v18 = vld [vmem:[#allocation6 + $0x68] sm:$0xff]  ;;  %v286_v19 = vld [vmem:[#allocation6 + $0x78] sm:$0xff] }
  0x2c   :  { %1303 = vmatprep.subr.bf16.mxu1 %v1302_v9  ;;  %v1308_v20 = vpack.c.bf16 %v281_v17, %v279_v16  ;;  %v1310_v21 = vpack.c.bf16 %v286_v19, %v284_v18  ;;  %v283_v22 = vld [vmem:[#allocation6 + $0x60] sm:$0xff]  ;;  %v285_v23 = vld [vmem:[#allocation6 + $0x70] sm:$0xff]  ;;  %v288_v24 = vld [vmem:[#allocation6 + $0x88] sm:$0xff] }
  0x2d   :  { %v290_v25 = vld [vmem:[#allocation6 + $0x98] sm:$0xff]  ;;  %v336_v26 = vld [vmem:[#allocation6 + $0x208] sm:$0xff]  ;;  %v1312_v28 = vpack.c.bf16 %v285_v23, %v283_v22  ;;  %v287_v29 = vld [vmem:[#allocation6 + $0x80] sm:$0xff] }
  0x2e   :  { %v338_v27 = vld [vmem:[#allocation6 + $0x218] sm:$0xff]  ;;  %v335_v31 = vld [vmem:[#allocation6 + $0x200] sm:$0xff]  ;;  %v337_v32 = vld [vmem:[#allocation6 + $0x210] sm:$0xff]  ;;  %v1314_v33 = vpack.c.bf16 %v290_v25, %v288_v24 }
  0x2f   :  { %1305 = vmatpush1.bf16.msra.mxu1 %v1304_v14  ;;  %v1362_v30 = vpack.c.bf16 %v338_v27, %v336_v26  ;;  %v289_v34 = vld [vmem:[#allocation6 + $0x90] sm:$0xff]  ;;  %v1364_v35 = vpack.c.bf16 %v337_v32, %v335_v31  ;;  %v340_v36 = vld [vmem:[#allocation6 + $0x228] sm:$0xff]  ;;  %v342_v37 = vld [vmem:[#allocation6 + $0x238] sm:$0xff] }
  0x30   :  { %1307 = vmatprep.subr.bf16.mxu1 %v1306_v15  ;;  %v292_v38 = vld [vmem:[#allocation6 + $0xa8] sm:$0xff]  ;;  %v294_v39 = vld [vmem:[#allocation6 + $0xb8] sm:$0xff]  ;;  %v1366_v40 = vpack.c.bf16 %v342_v37, %v340_v36  ;;  %v339_v41 = vld [vmem:[#allocation6 + $0x220] sm:$0xff]  ;;  %v1316_v43 = vpack.c.bf16 %v289_v34, %v287_v29 }
  0x31   :  { %1363 = vmatprep.subr.bf16.mxu0 %v1362_v30  ;;  %v341_v42 = vld [vmem:[#allocation6 + $0x230] sm:$0xff]  ;;  %v291_v44 = vld [vmem:[#allocation6 + $0xa0] sm:$0xff]  ;;  %v344_v46 = vld [vmem:[#allocation6 + $0x248] sm:$0xff]  ;;  %v1318_v48 = vpack.c.bf16 %v294_v39, %v292_v38 }
  0x32   :  { %1365 = vmatpush1.bf16.msra.mxu0 %v1364_v35  ;;  %v1368_v45 = vpack.c.bf16 %v341_v42, %v339_v41  ;;  %v346_v47 = vld [vmem:[#allocation6 + $0x258] sm:$0xff]  ;;  %v293_v49 = vld [vmem:[#allocation6 + $0xb0] sm:$0xff]  ;;  %v343_v51 = vld [vmem:[#allocation6 + $0x240] sm:$0xff] }
  0x33   :  { %1309 = vmatpush1.bf16.msra.mxu1 %v1308_v20  ;;  %1367 = vmatprep.subr.bf16.mxu0 %v1366_v40  ;;  %v1370_v50 = vpack.c.bf16 %v346_v47, %v344_v46  ;;  %v345_v52 = vld [vmem:[#allocation6 + $0x250] sm:$0xff]  ;;  %v296_v53 = vld [vmem:[#allocation6 + $0xc8] sm:$0xff]  ;;  %v298_v54 = vld [vmem:[#allocation6 + $0xd8] sm:$0xff]  ;;  %v1320_v58 = vpack.c.bf16 %v293_v49, %v291_v44 }
  0x34   :  { %1311 = vmatprep.subr.bf16.mxu1 %v1310_v21  ;;  %v348_v55 = vld [vmem:[#allocation6 + $0x268] sm:$0xff]  ;;  %v1372_v56 = vpack.c.bf16 %v345_v52, %v343_v51  ;;  %v350_v57 = vld [vmem:[#allocation6 + $0x278] sm:$0xff]  ;;  %v295_v59 = vld [vmem:[#allocation6 + $0xc0] sm:$0xff]  ;;  %v1322_v63 = vpack.c.bf16 %v298_v54, %v296_v53 }
  0x35   :  { %v1374_v60 = vpack.c.bf16 %v350_v57, %v348_v55  ;;  %v347_v61 = vld [vmem:[#allocation6 + $0x260] sm:$0xff]  ;;  %v349_v62 = vld [vmem:[#allocation6 + $0x270] sm:$0xff]  ;;  %v352_v2 = vld [vmem:[#allocation6 + $0x288] sm:$0xff] }
  0x36   :  { %1369 = vmatpush1.bf16.msra.mxu0 %v1368_v45  ;;  %v297_v1 = vld [vmem:[#allocation6 + $0xd0] sm:$0xff]  ;;  %v354_v3 = vld [vmem:[#allocation6 + $0x298] sm:$0xff]  ;;  %v300_v4 = vld [vmem:[#allocation6 + $0xe8] sm:$0xff]  ;;  %v1376_v6 = vpack.c.bf16 %v349_v62, %v347_v61 }
  0x37   :  { %1313 = vmatpush1.bf16.msra.mxu1 %v1312_v28  ;;  %1371 = vmatprep.subr.bf16.mxu0 %v1370_v50  ;;  %v302_v5 = vld [vmem:[#allocation6 + $0xf8] sm:$0xff]  ;;  %v1324_v7 = vpack.c.bf16 %v297_v1, %v295_v59  ;;  %v299_v8 = vld [vmem:[#allocation6 + $0xe0] sm:$0xff]  ;;  %v1378_v9 = vpack.c.bf16 %v354_v3, %v352_v2  ;;  %v353_v11 = vld [vmem:[#allocation6 + $0x290] sm:$0xff] }
  0x38   :  { %1315 = vmatprep.subr.bf16.mxu1 %v1314_v33  ;;  %v351_v10 = vld [vmem:[#allocation6 + $0x280] sm:$0xff]  ;;  %v1326_v12 = vpack.c.bf16 %v302_v5, %v300_v4  ;;  %v301_v13 = vld [vmem:[#allocation6 + $0xf0] sm:$0xff]  ;;  %v356_v14 = vld [vmem:[#allocation6 + $0x2a8] sm:$0xff] }
  0x39   :  { %v358_v15 = vld [vmem:[#allocation6 + $0x2b8] sm:$0xff]  ;;  %v304_v16 = vld [vmem:[#allocation6 + $0x108] sm:$0xff]  ;;  %v1380_v18 = vpack.c.bf16 %v353_v11, %v351_v10  ;;  %v1328_v19 = vpack.c.bf16 %v301_v13, %v299_v8  ;;  %v303_v20 = vld [vmem:[#allocation6 + $0x100] sm:$0xff] }
  0x3a   :  { %1373 = vmatpush1.bf16.msra.mxu0 %v1372_v56  ;;  %v306_v17 = vld [vmem:[#allocation6 + $0x118] sm:$0xff]  ;;  %v1382_v21 = vpack.c.bf16 %v358_v15, %v356_v14  ;;  %v355_v22 = vld [vmem:[#allocation6 + $0x2a0] sm:$0xff]  ;;  %v357_v23 = vld [vmem:[#allocation6 + $0x2b0] sm:$0xff] }
  0x3b   :  { %1317 = vmatpush1.bf16.msra.mxu1 %v1316_v43  ;;  %1375 = vmatprep.subr.bf16.mxu0 %v1374_v60  ;;  %v1330_v24 = vpack.c.bf16 %v306_v17, %v304_v16  ;;  %v305_v25 = vld [vmem:[#allocation6 + $0x110] sm:$0xff]  ;;  %v360_v26 = vld [vmem:[#allocation6 + $0x2c8] sm:$0xff]  ;;  %v362_v27 = vld [vmem:[#allocation6 + $0x2d8] sm:$0xff]  ;;  %v1384_v31 = vpack.c.bf16 %v357_v23, %v355_v22 }
  0x3c   :  { %1319 = vmatprep.subr.bf16.mxu1 %v1318_v48  ;;  %v308_v28 = vld [vmem:[#allocation6 + $0x128] sm:$0xff]  ;;  %v310_v29 = vld [vmem:[#allocation6 + $0x138] sm:$0xff]  ;;  %v307_v30 = vld [vmem:[#allocation6 + $0x120] sm:$0xff]  ;;  %v1332_v32 = vpack.c.bf16 %v305_v25, %v303_v20  ;;  %v1386_v33 = vpack.c.bf16 %v362_v27, %v360_v26 }
  0x3d   :  { %v359_v34 = vld [vmem:[#allocation6 + $0x2c0] sm:$0xff]  ;;  %v361_v35 = vld [vmem:[#allocation6 + $0x2d0] sm:$0xff]  ;;  %v112_v36 = vld [vmem:[#allocation3 + $0x8] sm:$0xff]  ;;  %v1334_v37 = vpack.c.bf16 %v310_v29, %v308_v28 }
  0x3e   :  { %1377 = vmatpush1.bf16.msra.mxu0 %v1376_v6  ;;  %v309_v38 = vld [vmem:[#allocation6 + $0x130] sm:$0xff]  ;;  %v364_v39 = vld [vmem:[#allocation6 + $0x2e8] sm:$0xff]  ;;  %v366_v40 = vld [vmem:[#allocation6 + $0x2f8] sm:$0xff]  ;;  %431 = vmatprep.mubr.f32.mxu1 %v112_v36  ;;  %v1388_v43 = vpack.c.bf16 %v361_v35, %v359_v34 }
  0x3f   :  { %1321 = vmatpush1.bf16.msra.mxu1 %v1320_v58  ;;  %1379 = vmatprep.subr.bf16.mxu0 %v1378_v9  ;;  %v312_v41 = vld [vmem:[#allocation6 + $0x148] sm:$0xff]  ;;  %v314_v42 = vld [vmem:[#allocation6 + $0x158] sm:$0xff]  ;;  %v1336_v44 = vpack.c.bf16 %v309_v38, %v307_v30  ;;  %v1390_v45 = vpack.c.bf16 %v366_v40, %v364_v39  ;;  %v363_v46 = vld [vmem:[#allocation6 + $0x2e0] sm:$0xff] }
  0x40   :  { %1323 = vmatprep.subr.bf16.mxu1 %v1322_v63  ;;  %v365_v47 = vld [vmem:[#allocation6 + $0x2f0] sm:$0xff]  ;;  %v1338_v48 = vpack.c.bf16 %v314_v42, %v312_v41  ;;  %v311_v49 = vld [vmem:[#allocation6 + $0x140] sm:$0xff]  ;;  %v316_v51 = vld [vmem:[#allocation6 + $0x168] sm:$0xff] }
  0x41   :  { %v313_v50 = vld [vmem:[#allocation6 + $0x150] sm:$0xff]  ;;  %v318_v52 = vld [vmem:[#allocation6 + $0x178] sm:$0xff]  ;;  %v1392_v53 = vpack.c.bf16 %v365_v47, %v363_v46  ;;  %v315_v56 = vld [vmem:[#allocation6 + $0x160] sm:$0xff] }
  0x42   :  { %1381 = vmatpush1.bf16.msra.mxu0 %v1380_v18  ;;  %v1340_v54 = vpack.c.bf16 %v313_v50, %v311_v49  ;;  %v1342_v55 = vpack.c.bf16 %v318_v52, %v316_v51  ;;  %v317_v57 = vld [vmem:[#allocation6 + $0x170] sm:$0xff]  ;;  %v320_v58 = vld [vmem:[#allocation6 + $0x188] sm:$0xff]  ;;  %v322_v59 = vld [vmem:[#allocation6 + $0x198] sm:$0xff] }
  0x43   :  { %1325 = vmatpush1.bf16.msra.mxu1 %v1324_v7  ;;  %1383 = vmatprep.subr.bf16.mxu0 %v1382_v21  ;;  %v113_v60 = vld [vmem:[#allocation3 + $0x10] sm:$0xff]  ;;  %v1344_v61 = vpack.c.bf16 %v317_v57, %v315_v56  ;;  %v1346_v62 = vpack.c.bf16 %v322_v59, %v320_v58  ;;  %v319_v63 = vld [vmem:[#allocation6 + $0x180] sm:$0xff]  ;;  %v324_v2 = vld [vmem:[#allocation6 + $0x1a8] sm:$0xff] }
  0x44   :  { %1327 = vmatprep.subr.bf16.mxu1 %v1326_v12  ;;  %v321_v1 = vld [vmem:[#allocation6 + $0x190] sm:$0xff]  ;;  %v326_v3 = vld [vmem:[#allocation6 + $0x1b8] sm:$0xff]  ;;  %v116_v4 = vld [vmem:[#allocation3 + $0x28] sm:$0xff] }
  0x45   :  { %v1348_v5 = vpack.c.bf16 %v321_v1, %v319_v63  ;;  %v1350_v6 = vpack.c.bf16 %v326_v3, %v324_v2  ;;  %v323_v7 = vld [vmem:[#allocation6 + $0x1a0] sm:$0xff]  ;;  %v325_v8 = vld [vmem:[#allocation6 + $0x1b0] sm:$0xff]  ;;  %v328_v9 = vld [vmem:[#allocation6 + $0x1c8] sm:$0xff] }
  0x46   :  { %1385 = vmatpush1.bf16.msra.mxu0 %v1384_v31  ;;  %v330_v10 = vld [vmem:[#allocation6 + $0x1d8] sm:$0xff]  ;;  %v119_v11 = vld [vmem:[#allocation3 + $0x40] sm:$0xff]  ;;  %v1352_v12 = vpack.c.bf16 %v325_v8, %v323_v7  ;;  %v329_v15 = vld [vmem:[#allocation6 + $0x1d0] sm:$0xff] }
  0x47   :  { %1329 = vmatpush1.bf16.msra.mxu1 %v1328_v19  ;;  %1387 = vmatprep.subr.bf16.mxu0 %v1386_v33  ;;  %v1354_v13 = vpack.c.bf16 %v330_v10, %v328_v9  ;;  %v327_v14 = vld [vmem:[#allocation6 + $0x1c0] sm:$0xff]  ;;  %v332_v16 = vld [vmem:[#allocation6 + $0x1e8] sm:$0xff]  ;;  %v334_v17 = vld [vmem:[#allocation6 + $0x1f8] sm:$0xff] }
  0x48   :  { %1331 = vmatprep.subr.bf16.mxu1 %v1330_v24  ;;  %v122_v18 = vld [vmem:[#allocation3 + $0x58] sm:$0xff]  ;;  %v1356_v19 = vpack.c.bf16 %v329_v15, %v327_v14  ;;  %v1358_v20 = vpack.c.bf16 %v334_v17, %v332_v16  ;;  %v331_v21 = vld [vmem:[#allocation6 + $0x1e0] sm:$0xff]  ;;  %v333_v22 = vld [vmem:[#allocation6 + $0x1f0] sm:$0xff] }
  0x49   :  { %v125_v23 = vld [vmem:[#allocation3 + $0x70] sm:$0xff]  ;;  %v1360_v24 = vpack.c.bf16 %v333_v22, %v331_v21  ;;  %v128_v25 = vld [vmem:[#allocation3 + $0x88] sm:$0xff]  ;;  %v111_v26 = vld [vmem:[#allocation3] sm:$0xff] }
  0x4a   :  { %1389 = vmatpush1.bf16.msra.mxu0 %v1388_v43  ;;  %v115_v27 = vld [vmem:[#allocation3 + $0x20] sm:$0xff]  ;;  %v114_v29 = vld [vmem:[#allocation3 + $0x18] sm:$0xff]  ;;  %v121_v33 = vld [vmem:[#allocation3 + $0x50] sm:$0xff] }
  0x4b   :  { %1333 = vmatpush1.bf16.msra.mxu1 %v1332_v32  ;;  %1391 = vmatprep.subr.bf16.mxu0 %v1390_v45  ;;  %v131_v28 = vld [vmem:[#allocation3 + $0xa0] sm:$0xff]  ;;  %v118_v30 = vld [vmem:[#allocation3 + $0x38] sm:$0xff]  ;;  %v117_v32 = vld [vmem:[#allocation3 + $0x30] sm:$0xff] }
  0x4c   :  { %1335 = vmatprep.subr.bf16.mxu1 %v1334_v37  ;;  %v134_v31 = vld [vmem:[#allocation3 + $0xb8] sm:$0xff]  ;;  %v137_v34 = vld [vmem:[#allocation3 + $0xd0] sm:$0xff]  ;;  %v120_v35 = vld [vmem:[#allocation3 + $0x48] sm:$0xff] }
  0x4d   :  { %v124_v36 = vld [vmem:[#allocation3 + $0x68] sm:$0xff]  ;;  %v123_v38 = vld [vmem:[#allocation3 + $0x60] sm:$0xff]  ;;  %v126_v41 = vld [vmem:[#allocation3 + $0x78] sm:$0xff] }
  0x4e   :  { %1393 = vmatpush1.bf16.msra.mxu0 %v1392_v53  ;;  %v140_v37 = vld [vmem:[#allocation3 + $0xe8] sm:$0xff]  ;;  %v127_v39 = vld [vmem:[#allocation3 + $0x80] sm:$0xff]  ;;  %v130_v42 = vld [vmem:[#allocation3 + $0x98] sm:$0xff] }
  0x4f   :  { %1337 = vmatpush1.bf16.msra.mxu1 %v1336_v44  ;;  %v143_v40 = vld [vmem:[#allocation3 + $0x100] sm:$0xff]  ;;  %v146_v43 = vld [vmem:[#allocation3 + $0x118] sm:$0xff]  ;;  %v129_v44 = vld [vmem:[#allocation3 + $0x90] sm:$0xff] }
  0x50   :  { %1339 = vmatprep.subr.bf16.mxu1 %v1338_v48  ;;  %v133_v45 = vld [vmem:[#allocation3 + $0xb0] sm:$0xff]  ;;  %v132_v47 = vld [vmem:[#allocation3 + $0xa8] sm:$0xff]  ;;  %v135_v50 = vld [vmem:[#allocation3 + $0xc0] sm:$0xff] }
  0x51   :  { %689 = vmatmul.mubr.f32.vlgmr.msra.gmra.mrb[0].mxu0 %v113_v60  ;;  %v149_v46 = vld [vmem:[#allocation3 + $0x130] sm:$0xff]  ;;  %v136_v48 = vld [vmem:[#allocation3 + $0xc8] sm:$0xff]  ;;  %v139_v51 = vld [vmem:[#allocation3 + $0xe0] sm:$0xff] }
  0x52   :  { %694 = vmatprep.mubr.f32.mxu0 %v1544_v0  ;;  %v152_v49 = vld [vmem:[#allocation3 + $0x148] sm:$0xff]  ;;  %v155_v52 = vld [vmem:[#allocation3 + $0x160] sm:$0xff]  ;;  %v138_v53 = vld [vmem:[#allocation3 + $0xd8] sm:$0xff] }
  0x53   :  { %1341 = vmatpush1.bf16.msra.mxu1 %v1340_v54  ;;  %v142_v54 = vld [vmem:[#allocation3 + $0xf8] sm:$0xff]  ;;  %v141_v56 = vld [vmem:[#allocation3 + $0xf0] sm:$0xff]  ;;  %v144_v59 = vld [vmem:[#allocation3 + $0x108] sm:$0xff] }
  0x54   :  { %1343 = vmatprep.subr.bf16.mxu1 %v1342_v55  ;;  %v158_v55 = vld [vmem:[#allocation3 + $0x178] sm:$0xff]  ;;  %v145_v57 = vld [vmem:[#allocation3 + $0x110] sm:$0xff]  ;;  %v148_v60 = vld [vmem:[#allocation3 + $0x128] sm:$0xff] }
  0x55   :  { %695 = vmatmul.mubr.f32.gmra.mrb[2].mxu0 %v116_v4  ;;  %v161_v58 = vld [vmem:[#allocation3 + $0x190] sm:$0xff]  ;;  %v151_v63 = vld [vmem:[#allocation3 + $0x140] sm:$0xff]  ;;  %v150_v2 = vld [vmem:[#allocation3 + $0x138] sm:$0xff] }
  0x56   :  { %700 = vmatprep.mubr.f32.mxu0 %v1544_v0  ;;  %v167_v1 = vld [vmem:[#allocation3 + $0x1c0] sm:$0xff]  ;;  %v154_v3 = vld [vmem:[#allocation3 + $0x158] sm:$0xff]  ;;  %v173_v7 = vld [vmem:[#allocation3 + $0x1f0] sm:$0xff] }
  0x57   :  { %1345 = vmatpush1.bf16.msra.mxu1 %v1344_v61  ;;  %v164_v61 = vld [vmem:[#allocation3 + $0x1a8] sm:$0xff]  ;;  %v170_v4 = vld [vmem:[#allocation3 + $0x1d8] sm:$0xff]  ;;  %v165_v17 = vld [vmem:[#allocation3 + $0x1b0] sm:$0xff] }
  0x58   :  { %1347 = vmatprep.subr.bf16.mxu1 %v1346_v62  ;;  %v147_v62 = vld [vmem:[#allocation3 + $0x120] sm:$0xff]  ;;  %v156_v8 = vld [vmem:[#allocation3 + $0x168] sm:$0xff]  ;;  %v162_v14 = vld [vmem:[#allocation3 + $0x198] sm:$0xff] }
  0x59   :  { %701 = vmatmul.mubr.f32.gmra.mrb[4].mxu0 %v119_v11  ;;  %v160_v9 = vld [vmem:[#allocation3 + $0x188] sm:$0xff]  ;;  %v159_v11 = vld [vmem:[#allocation3 + $0x180] sm:$0xff]  ;;  %v166_v15 = vld [vmem:[#allocation3 + $0x1b8] sm:$0xff] }
  0x5a   :  { %706 = vmatprep.mubr.f32.mxu0 %v1544_v0  ;;  %v176_v10 = vld [vmem:[#allocation3 + $0x208] sm:$0xff]  ;;  %v182_v16 = vld [vmem:[#allocation3 + $0x238] sm:$0xff] }
  0x5b   :  { %1349 = vmatpush1.bf16.msra.mxu1 %v1348_v5  ;;  %v153_v5 = vld [vmem:[#allocation3 + $0x150] sm:$0xff]  ;;  %v172_v21 = vld [vmem:[#allocation3 + $0x1e8] sm:$0xff] }
  0x5c   :  { %1351 = vmatprep.subr.bf16.mxu1 %v1350_v6  ;;  %v157_v6 = vld [vmem:[#allocation3 + $0x170] sm:$0xff]  ;;  %v188_v22 = vld [vmem:[#allocation3 + $0x268] sm:$0xff] }
  0x5d   :  { %707 = vmatmul.mubr.f32.gmra.mrb[6].mxu0 %v122_v18  ;;  %v169_v18 = vld [vmem:[#allocation3 + $0x1d0] sm:$0xff] }
  0x5e   :  { %712 = vmatprep.mubr.f32.mxu0 %v1544_v0 }
  0x5f   :  { %1353 = vmatpush1.bf16.msra.mxu1 %v1352_v12  ;;  %v163_v12 = vld [vmem:[#allocation3 + $0x1a0] sm:$0xff] }
  0x60   :  { %1355 = vmatprep.subr.bf16.mxu1 %v1354_v13  ;;  %v179_v13 = vld [vmem:[#allocation3 + $0x220] sm:$0xff] }
  0x61   :  { %713 = vmatmul.mubr.f32.gmra.mrb[8].mxu0 %v125_v23  ;;  %v171_v23 = vld [vmem:[#allocation3 + $0x1e0] sm:$0xff] }
  0x62   :  { %718 = vmatprep.mubr.f32.mxu0 %v1544_v0 }
  0x63   :  { %1357 = vmatpush1.bf16.msra.mxu1 %v1356_v19  ;;  %v185_v19 = vld [vmem:[#allocation3 + $0x250] sm:$0xff] }
  0x64   :  { %1359 = vmatprep.subr.bf16.mxu1 %v1358_v20  ;;  %v168_v20 = vld [vmem:[#allocation3 + $0x1c8] sm:$0xff] }
  0x65   :  { %719 = vmatmul.mubr.f32.gmra.mrb[10].mxu0 %v128_v25  ;;  %v191_v25 = vld [vmem:[#allocation3 + $0x280] sm:$0xff] }
  0x66   :  { %724 = vmatprep.mubr.f32.mxu0 %v1544_v0 }
  0x67   :  { %1361 = vmatpush1.bf16.msra.mxu1 %v1360_v24  ;;  %v175_v24 = vld [vmem:[#allocation3 + $0x200] sm:$0xff] }
  0x69   :  { %725 = vmatmul.mubr.f32.gmra.mrb[12].mxu0 %v131_v28  ;;  %v194_v28 = vld [vmem:[#allocation3 + $0x298] sm:$0xff] }
  0x6a   :  { %432 = vmatmul.mubr.f32.vlgmr.msra.gmra.mrb[0].mxu1 %v111_v26  ;;  %730 = vmatprep.mubr.f32.mxu0 %v1544_v0  ;;  %v174_v26 = vld [vmem:[#allocation3 + $0x1f8] sm:$0xff] }
  0x6b   :  { %437 = vmatprep.mubr.f32.mxu1 %v115_v27  ;;  %v178_v27 = vld [vmem:[#allocation3 + $0x218] sm:$0xff] }
  0x6d   :  { %731 = vmatmul.mubr.f32.gmra.mrb[14].mxu0 %v134_v31  ;;  %v197_v31 = vld [vmem:[#allocation3 + $0x2b0] sm:$0xff] }
  0x6e   :  { %438 = vmatmul.mubr.f32.gmra.mrb[2].mxu1 %v114_v29  ;;  %736 = vmatprep.mubr.f32.mxu0 %v1544_v0  ;;  %v177_v29 = vld [vmem:[#allocation3 + $0x210] sm:$0xff] }
  0x6f   :  { %443 = vmatprep.mubr.f32.mxu1 %v118_v30  ;;  %v181_v30 = vld [vmem:[#allocation3 + $0x230] sm:$0xff] }
  0x71   :  { %737 = vmatmul.mubr.f32.gmra.mrb[16].mxu0 %v137_v34  ;;  %v200_v34 = vld [vmem:[#allocation3 + $0x2c8] sm:$0xff] }
  0x72   :  { %444 = vmatmul.mubr.f32.gmra.mrb[4].mxu1 %v117_v32  ;;  %742 = vmatprep.mubr.f32.mxu0 %v1544_v0  ;;  %v180_v32 = vld [vmem:[#allocation3 + $0x228] sm:$0xff] }
  0x73   :  { %449 = vmatprep.mubr.f32.mxu1 %v121_v33  ;;  %v184_v33 = vld [vmem:[#allocation3 + $0x248] sm:$0xff] }
  0x75   :  { %743 = vmatmul.mubr.f32.gmra.mrb[18].mxu0 %v140_v37  ;;  %v203_v37 = vld [vmem:[#allocation3 + $0x2e0] sm:$0xff] }
  0x76   :  { %450 = vmatmul.mubr.f32.gmra.mrb[6].mxu1 %v120_v35  ;;  %748 = vmatprep.mubr.f32.mxu0 %v1544_v0  ;;  %v183_v35 = vld [vmem:[#allocation3 + $0x240] sm:$0xff] }
  0x77   :  { %455 = vmatprep.mubr.f32.mxu1 %v124_v36  ;;  %v187_v36 = vld [vmem:[#allocation3 + $0x260] sm:$0xff] }
  0x79   :  { %749 = vmatmul.mubr.f32.gmra.mrb[20].mxu0 %v143_v40  ;;  %v206_v40 = vld [vmem:[#allocation3 + $0x2f8] sm:$0xff] }
  0x7a   :  { %456 = vmatmul.mubr.f32.gmra.mrb[8].mxu1 %v123_v38  ;;  %754 = vmatprep.mubr.f32.mxu0 %v1544_v0  ;;  %v186_v38 = vld [vmem:[#allocation3 + $0x258] sm:$0xff] }
  0x7b   :  { %461 = vmatprep.mubr.f32.mxu1 %v127_v39  ;;  %v190_v39 = vld [vmem:[#allocation3 + $0x278] sm:$0xff] }
  0x7d   :  { %755 = vmatmul.mubr.f32.gmra.mrb[22].mxu0 %v146_v43  ;;  %v192_v43 = vld [vmem:[#allocation3 + $0x288] sm:$0xff] }
  0x7e   :  { %462 = vmatmul.mubr.f32.gmra.mrb[10].mxu1 %v126_v41  ;;  %760 = vmatprep.mubr.f32.mxu0 %v1544_v0  ;;  %v189_v41 = vld [vmem:[#allocation3 + $0x270] sm:$0xff] }
  0x7f   :  { %467 = vmatprep.mubr.f32.mxu1 %v130_v42  ;;  %v193_v42 = vld [vmem:[#allocation3 + $0x290] sm:$0xff] }
  0x81   :  { %761 = vmatmul.mubr.f32.gmra.mrb[24].mxu0 %v149_v46  ;;  %v199_v46 = vld [vmem:[#allocation3 + $0x2c0] sm:$0xff] }
  0x82   :  { %468 = vmatmul.mubr.f32.gmra.mrb[12].mxu1 %v129_v44  ;;  %766 = vmatprep.mubr.f32.mxu0 %v1544_v0  ;;  %v196_v44 = vld [vmem:[#allocation3 + $0x2a8] sm:$0xff] }
  0x83   :  { %473 = vmatprep.mubr.f32.mxu1 %v133_v45  ;;  %v195_v45 = vld [vmem:[#allocation3 + $0x2a0] sm:$0xff] }
  0x85   :  { %767 = vmatmul.mubr.f32.gmra.mrb[26].mxu0 %v152_v49  ;;  %v205_v49 = vld [vmem:[#allocation3 + $0x2f0] sm:$0xff] }
  0x86   :  { %474 = vmatmul.mubr.f32.gmra.mrb[14].mxu1 %v132_v47  ;;  %772 = vmatprep.mubr.f32.mxu0 %v1544_v0  ;;  %v198_v47 = vld [vmem:[#allocation3 + $0x2b8] sm:$0xff] }
  0x87   :  { %479 = vmatprep.mubr.f32.mxu1 %v136_v48  ;;  %v202_v48 = vld [vmem:[#allocation3 + $0x2d8] sm:$0xff] }
  0x89   :  { %773 = vmatmul.mubr.f32.gmra.mrb[28].mxu0 %v155_v52 }
  0x8a   :  { %480 = vmatmul.mubr.f32.gmra.mrb[16].mxu1 %v135_v50  ;;  %778 = vmatprep.mubr.f32.mxu0 %v1544_v0  ;;  %v204_v50 = vld [vmem:[#allocation3 + $0x2e8] sm:$0xff] }
  0x8b   :  { %485 = vmatprep.mubr.f32.mxu1 %v139_v51 }
  0x8d   :  { %779 = vmatmul.mubr.f32.gmra.mrb[30].mxu0 %v158_v55  ;;  %v1078_v55 = vlaneseq }
  0x8e   :  { %486 = vmatmul.mubr.f32.gmra.mrb[18].mxu1 %v138_v53  ;;  %784 = vmatprep.mubr.f32.mxu0 %v1544_v0 }
  0x8f   :  { %491 = vmatprep.mubr.f32.mxu1 %v142_v54 }
  0x91   :  { %785 = vmatmul.mubr.f32.gmra.mrb[32].mxu0 %v161_v58  ;;  %v1079_v58 = vshrl.u32 %v1078_v55, 7 }
  0x92   :  { %492 = vmatmul.mubr.f32.gmra.mrb[20].mxu1 %v141_v56  ;;  %790 = vmatprep.mubr.f32.mxu0 %v1544_v0 }
  0x93   :  { %497 = vmatprep.mubr.f32.mxu1 %v145_v57 }
  0x95   :  { %791 = vmatmul.mubr.f32.gmra.mrb[34].mxu0 %v164_v61  ;;  %v1080_v61 = vsub.s32 0, %v1079_v58 }
  0x96   :  { %498 = vmatmul.mubr.f32.gmra.mrb[22].mxu1 %v144_v59  ;;  %796 = vmatprep.mubr.f32.mxu0 %v1544_v0 }
  0x97   :  { %503 = vmatprep.mubr.f32.mxu1 %v148_v60 }
  0x99   :  { %797 = vmatmul.mubr.f32.gmra.mrb[36].mxu0 %v167_v1  ;;  %v1084_v1 = vsub.s32 1, %v1079_v58 }
  0x9a   :  { %504 = vmatmul.mubr.f32.gmra.mrb[24].mxu1 %v147_v62  ;;  %802 = vmatprep.mubr.f32.mxu0 %v1544_v0 }
  0x9b   :  { %509 = vmatprep.mubr.f32.mxu1 %v151_v63  ;;  %v1076_v63 = vld [vmem:[%s1845_s2] sm:$0x3]  ;;  %s1545_s2 = smov [#allocation8]  }
  0x9c   :  { %s1285_s13 = sshll.u32 %s1545_s2, 4  ;;  %s1286_s13 = int_to_ptr.vmem [resolvable:$true] %s1285_s13 }
  0x9d   :  { %803 = vmatmul.mubr.f32.gmra.mrb[38].mxu0 %v170_v4  ;;  %s1510_s14 = scalar_lea.vmem %s1286_s13, 8192  ;;  %p1515_p3 = scmp.lt.s32.totalorder %s1286_s13, %s1286_s13 }
  0x9e   :  { %510 = vmatmul.mubr.f32.gmra.mrb[26].mxu1 %v150_v2  ;;  %808 = vmatprep.mubr.f32.mxu0 %v1544_v0  ;;  %p1511_p2 = scmp.ne.s32.totalorder %s1286_s13, %s1510_s14  ;;  %p1516_p4 = scmp.lt.s32.totalorder %s1510_s14, %s1510_s14 }
  0x9f   :  { %515 = vmatprep.mubr.f32.mxu1 %v154_v3  ;;  %v1628_v3 = vrot.slane %v1076_v63, %v1080_v61 }
  0xa0   :  { %p1517_p5 = por %p1516_p4, %p1515_p3 }
  0xa1   :  { %809 = vmatmul.mubr.f32.gmra.mrb[40].mxu0 %v173_v7 }
  0xa2   :  { %516 = vmatmul.mubr.f32.gmra.mrb[28].mxu1 %v153_v5  ;;  %814 = vmatprep.mubr.f32.mxu0 %v1544_v0  ;;  %p1518_p6 = pnand %p1517_p5, %p1511_p2 }
  0xa3   :  { %521 = vmatprep.mubr.f32.mxu1 %v157_v6  ;;  %v1630_v6 = vrot.slane %v1076_v63, %v1084_v1 }
  0xa5   :  { %815 = vmatmul.mubr.f32.gmra.mrb[42].mxu0 %v176_v10 }
  0xa6   :  { %522 = vmatmul.mubr.f32.gmra.mrb[30].mxu1 %v156_v8  ;;  %820 = vmatprep.mubr.f32.mxu0 %v1544_v0 }
  0xa7   :  { %527 = vmatprep.mubr.f32.mxu1 %v160_v9 }
  0xa9   :  { %821 = vmatmul.mubr.f32.gmra.mrb[44].mxu0 %v179_v13 }
  0xaa   :  { %528 = vmatmul.mubr.f32.gmra.mrb[32].mxu1 %v159_v11  ;;  %826 = vmatprep.mubr.f32.mxu0 %v1544_v0 }
  0xab   :  { %533 = vmatprep.mubr.f32.mxu1 %v163_v12 }
  0xad   :  { %827 = vmatmul.mubr.f32.gmra.mrb[46].mxu0 %v182_v16 }
  0xae   :  { %534 = vmatmul.mubr.f32.gmra.mrb[34].mxu1 %v162_v14  ;;  %832 = vmatprep.mubr.f32.mxu0 %v1544_v0 }
  0xaf   :  { %539 = vmatprep.mubr.f32.mxu1 %v166_v15 }
  0xb1   :  { %833 = vmatmul.mubr.f32.gmra.mrb[48].mxu0 %v185_v19 }
  0xb2   :  { %540 = vmatmul.mubr.f32.gmra.mrb[36].mxu1 %v165_v17  ;;  %838 = vmatprep.mubr.f32.mxu0 %v1544_v0 }
  0xb3   :  { %545 = vmatprep.mubr.f32.mxu1 %v169_v18 }
  0xb5   :  { %839 = vmatmul.mubr.f32.gmra.mrb[50].mxu0 %v188_v22 }
  0xb6   :  { %546 = vmatmul.mubr.f32.gmra.mrb[38].mxu1 %v168_v20  ;;  %844 = vmatprep.mubr.f32.mxu0 %v1544_v0 }
  0xb7   :  { %551 = vmatprep.mubr.f32.mxu1 %v172_v21 }
  0xb9   :  { %845 = vmatmul.mubr.f32.gmra.mrb[52].mxu0 %v191_v25 }
  0xba   :  { %552 = vmatmul.mubr.f32.gmra.mrb[40].mxu1 %v171_v23  ;;  %850 = vmatprep.mubr.f32.mxu0 %v1544_v0 }
  0xbb   :  { %557 = vmatprep.mubr.f32.mxu1 %v175_v24 }
  0xbd   :  { %851 = vmatmul.mubr.f32.gmra.mrb[54].mxu0 %v194_v28 }
  0xbe   :  { %558 = vmatmul.mubr.f32.gmra.mrb[42].mxu1 %v174_v26  ;;  %856 = vmatprep.mubr.f32.mxu0 %v1544_v0 }
  0xbf   :  { %563 = vmatprep.mubr.f32.mxu1 %v178_v27 }
  0xc1   :  { %857 = vmatmul.mubr.f32.gmra.mrb[56].mxu0 %v197_v31 }
  0xc2   :  { %564 = vmatmul.mubr.f32.gmra.mrb[44].mxu1 %v177_v29  ;;  %862 = vmatprep.mubr.f32.mxu0 %v1544_v0 }
  0xc3   :  { %569 = vmatprep.mubr.f32.mxu1 %v181_v30 }
  0xc5   :  { %863 = vmatmul.mubr.f32.gmra.mrb[58].mxu0 %v200_v34 }
  0xc6   :  { %570 = vmatmul.mubr.f32.gmra.mrb[46].mxu1 %v180_v32  ;;  %868 = vmatprep.mubr.f32.mxu0 %v1544_v0 }
  0xc7   :  { %575 = vmatprep.mubr.f32.mxu1 %v184_v33 }
  0xc9   :  { %869 = vmatmul.mubr.f32.gmra.mrb[60].mxu0 %v203_v37 }
  0xca   :  { %576 = vmatmul.mubr.f32.gmra.mrb[48].mxu1 %v183_v35  ;;  %874 = vmatprep.mubr.f32.mxu0 %v1544_v0  ;;  %v201_v0 = vld [vmem:[#allocation3 + $0x2d0] sm:$0xff] }
  0xcb   :  { %581 = vmatprep.mubr.f32.mxu1 %v187_v36 }
  0xcd   :  { %875 = vmatmul.mubr.f32.gmra.mrb[62].mxu0 %v206_v40 }
  0xce   :  { %582 = vmatmul.mubr.f32.gmra.mrb[50].mxu1 %v186_v38 }
  0xcf   :  { %587 = vmatprep.mubr.f32.mxu1 %v190_v39 }
  0xd2   :  { %588 = vmatmul.mubr.f32.gmra.mrb[52].mxu1 %v189_v41 }
  0xd3   :  { %593 = vmatprep.mubr.f32.mxu1 %v193_v42 }
  0xd6   :  { %594 = vmatmul.mubr.f32.gmra.mrb[54].mxu1 %v192_v43 }
  0xd7   :  { %599 = vmatprep.mubr.f32.mxu1 %v196_v44 }
  0xda   :  { %600 = vmatmul.mubr.f32.gmra.mrb[56].mxu1 %v195_v45 }
  0xdb   :  { %605 = vmatprep.mubr.f32.mxu1 %v199_v46 }
  0xde   :  { %606 = vmatmul.mubr.f32.gmra.mrb[58].mxu1 %v198_v47 }
  0xdf   :  { %611 = vmatprep.mubr.f32.mxu1 %v202_v48 }
  0xe2   :  { %612 = vmatmul.mubr.f32.gmra.mrb[60].mxu1 %v201_v0 }
  0xe3   :  { %617 = vmatprep.mubr.f32.mxu1 %v205_v49 }
  0xe6   :  { %618 = vmatmul.mubr.f32.gmra.mrb[62].mxu1 %v204_v50 }
 0x124   :  { %v690_v51 = vpop.f32.mrb[0].mxu0 }
 0x125   :  { %v692_v52 = vpop.f32.mrb[1].mxu0 }
 0x128   :  { %v696_v53 = vpop.f32.mrb[2].mxu0 }
 0x129   :  { %v698_v54 = vpop.f32.mrb[3].mxu0 }
 0x12c   :  { %v702_v56 = vpop.f32.mrb[4].mxu0 }
 0x12d   :  { %v704_v57 = vpop.f32.mrb[5].mxu0 }
 0x130   :  { %v708_v59 = vpop.f32.mrb[6].mxu0 }
 0x131   :  { %v710_v60 = vpop.f32.mrb[7].mxu0 }
 0x134   :  { %v714_v62 = vpop.f32.mrb[8].mxu0 }
 0x135   :  { %v716_v2 = vpop.f32.mrb[9].mxu0 }
 0x138   :  { %v720_v4 = vpop.f32.mrb[10].mxu0 }
 0x139   :  { %v722_v7 = vpop.f32.mrb[11].mxu0 }
 0x13c   :  { %v1633_v12 = vpop.f32.mrb[12].mxu0 }
 0x13d   :  { %v433_v5 = vpop.f32.mrb[0].mxu1  ;;  %v1636_v15 = vpop.f32.mrb[13].mxu0 }
 0x13e   :  { %v691_v8 = vadd.f32 %v690_v51, %v433_v5  ;;  %v435_v9 = vpop.f32.mrb[1].mxu1 }
 0x13f   :  { %v693_v10 = vadd.f32 %v692_v52, %v435_v9 }
 0x140   :  { %v1088_v11 = vadd.f32 %v1628_v3, %v691_v8  ;;  %v1639_v22 = vpop.f32.mrb[14].mxu0 }
 0x141   :  { %v1089_v13 = vadd.f32 %v1630_v6, %v693_v10  ;;  %v439_v14 = vpop.f32.mrb[2].mxu1  ;;  %v1642_v25 = vpop.f32.mrb[15].mxu0 }
 0x142   :  { %v1152_v16 = vmax.f32 %v1088_v11, 0.0  ;;  %v697_v17 = vadd.f32 %v696_v53, %v439_v14  ;;  %v441_v18 = vpop.f32.mrb[3].mxu1 }
 0x143   :  { %v1153_v19 = vmax.f32 %v1089_v13, 0.0  ;;  %v699_v20 = vadd.f32 %v698_v54, %v441_v18 }
 0x144   :  { %1216 = vst [vmem:[#allocation8] sm:$0xff] %v1152_v16  ;;  %v1090_v21 = vadd.f32 %v1628_v3, %v697_v17  ;;  %v1645_v32 = vpop.f32.mrb[16].mxu0 }
 0x145   :  { %1217 = vst [vmem:[#allocation8 + $0x8] sm:$0xff] %v1153_v19  ;;  %v1091_v23 = vadd.f32 %v1630_v6, %v699_v20  ;;  %v445_v24 = vpop.f32.mrb[4].mxu1  ;;  %v1648_v35 = vpop.f32.mrb[17].mxu0 }
 0x146   :  { %v1154_v26 = vmax.f32 %v1090_v21, 0.0  ;;  %v703_v27 = vadd.f32 %v702_v56, %v445_v24  ;;  %v447_v28 = vpop.f32.mrb[5].mxu1 }
 0x147   :  { %v1155_v29 = vmax.f32 %v1091_v23, 0.0  ;;  %v705_v30 = vadd.f32 %v704_v57, %v447_v28 }
 0x148   :  { %1218 = vst [vmem:[#allocation8 + $0x10] sm:$0xff] %v1154_v26  ;;  %v1092_v31 = vadd.f32 %v1628_v3, %v703_v27  ;;  %v1651_v42 = vpop.f32.mrb[18].mxu0 }
 0x149   :  { %1219 = vst [vmem:[#allocation8 + $0x18] sm:$0xff] %v1155_v29  ;;  %v1093_v33 = vadd.f32 %v1630_v6, %v705_v30  ;;  %v451_v34 = vpop.f32.mrb[6].mxu1  ;;  %v1654_v45 = vpop.f32.mrb[19].mxu0 }
 0x14a   :  { %v1156_v36 = vmax.f32 %v1092_v31, 0.0  ;;  %v709_v37 = vadd.f32 %v708_v59, %v451_v34  ;;  %v453_v38 = vpop.f32.mrb[7].mxu1 }
 0x14b   :  { %v1157_v39 = vmax.f32 %v1093_v33, 0.0  ;;  %v711_v40 = vadd.f32 %v710_v60, %v453_v38 }
 0x14c   :  { %1220 = vst [vmem:[#allocation8 + $0x20] sm:$0xff] %v1156_v36  ;;  %v1094_v41 = vadd.f32 %v1628_v3, %v709_v37  ;;  %v1657_v51 = vpop.f32.mrb[20].mxu0 }
 0x14d   :  { %1221 = vst [vmem:[#allocation8 + $0x28] sm:$0xff] %v1157_v39  ;;  %v1095_v43 = vadd.f32 %v1630_v6, %v711_v40  ;;  %v457_v44 = vpop.f32.mrb[8].mxu1  ;;  %v1660_v54 = vpop.f32.mrb[21].mxu0 }
 0x14e   :  { %v1158_v46 = vmax.f32 %v1094_v41, 0.0  ;;  %v715_v47 = vadd.f32 %v714_v62, %v457_v44  ;;  %v459_v48 = vpop.f32.mrb[9].mxu1 }
 0x14f   :  { %v1159_v0 = vmax.f32 %v1095_v43, 0.0  ;;  %v717_v49 = vadd.f32 %v716_v2, %v459_v48 }
 0x150   :  { %1222 = vst [vmem:[#allocation8 + $0x30] sm:$0xff] %v1158_v46  ;;  %v1096_v50 = vadd.f32 %v1628_v3, %v715_v47  ;;  %v1663_v61 = vpop.f32.mrb[22].mxu0 }
 0x151   :  { %1223 = vst [vmem:[#allocation8 + $0x38] sm:$0xff] %v1159_v0  ;;  %v1097_v52 = vadd.f32 %v1630_v6, %v717_v49  ;;  %v463_v53 = vpop.f32.mrb[10].mxu1  ;;  %v1666_v1 = vpop.f32.mrb[23].mxu0 }
 0x152   :  { %v1160_v55 = vmax.f32 %v1096_v50, 0.0  ;;  %v721_v56 = vadd.f32 %v720_v4, %v463_v53  ;;  %v465_v57 = vpop.f32.mrb[11].mxu1 }
 0x153   :  { %v1161_v58 = vmax.f32 %v1097_v52, 0.0  ;;  %v723_v59 = vadd.f32 %v722_v7, %v465_v57 }
 0x154   :  { %1224 = vst [vmem:[#allocation8 + $0x40] sm:$0xff] %v1160_v55  ;;  %v1098_v60 = vadd.f32 %v1628_v3, %v721_v56  ;;  %v1671_v10 = vpop.f32.mrb[24].mxu0 }
 0x155   :  { %1225 = vst [vmem:[#allocation8 + $0x48] sm:$0xff] %v1161_v58  ;;  %v1099_v62 = vadd.f32 %v1630_v6, %v723_v59  ;;  %v469_v63 = vpop.f32.mrb[12].mxu1  ;;  %v1674_v14 = vpop.f32.mrb[25].mxu0 }
 0x156   :  { %v1162_v2 = vmax.f32 %v1098_v60, 0.0  ;;  %v727_v5 = vadd.f32 %v1633_v12, %v469_v63  ;;  %v471_v8 = vpop.f32.mrb[13].mxu1 }
 0x157   :  { %v1163_v9 = vmax.f32 %v1099_v62, 0.0  ;;  %v729_v4 = vadd.f32 %v1636_v15, %v471_v8 }
 0x158   :  { %1226 = vst [vmem:[#allocation8 + $0x50] sm:$0xff] %v1162_v2  ;;  %v1100_v7 = vadd.f32 %v1628_v3, %v727_v5  ;;  %v1679_v20 = vpop.f32.mrb[26].mxu0 }
 0x159   :  { %1227 = vst [vmem:[#allocation8 + $0x58] sm:$0xff] %v1163_v9  ;;  %v1101_v11 = vadd.f32 %v1630_v6, %v729_v4  ;;  %v475_v13 = vpop.f32.mrb[14].mxu1  ;;  %v1682_v24 = vpop.f32.mrb[27].mxu0 }
 0x15a   :  { %v1164_v16 = vmax.f32 %v1100_v7, 0.0  ;;  %v733_v17 = vadd.f32 %v1639_v22, %v475_v13  ;;  %v477_v18 = vpop.f32.mrb[15].mxu1 }
 0x15b   :  { %v1165_v12 = vmax.f32 %v1101_v11, 0.0  ;;  %v735_v19 = vadd.f32 %v1642_v25, %v477_v18 }
 0x15c   :  { %1228 = vst [vmem:[#allocation8 + $0x60] sm:$0xff] %v1164_v16  ;;  %v1102_v15 = vadd.f32 %v1628_v3, %v733_v17  ;;  %v1687_v30 = vpop.f32.mrb[28].mxu0 }
 0x15d   :  { %1229 = vst [vmem:[#allocation8 + $0x68] sm:$0xff] %v1165_v12  ;;  %v1103_v21 = vadd.f32 %v1630_v6, %v735_v19  ;;  %v481_v23 = vpop.f32.mrb[16].mxu1  ;;  %v1690_v34 = vpop.f32.mrb[29].mxu0 }
 0x15e   :  { %v1166_v26 = vmax.f32 %v1102_v15, 0.0  ;;  %v739_v27 = vadd.f32 %v1645_v32, %v481_v23  ;;  %v483_v28 = vpop.f32.mrb[17].mxu1 }
 0x15f   :  { %v1167_v22 = vmax.f32 %v1103_v21, 0.0  ;;  %v741_v29 = vadd.f32 %v1648_v35, %v483_v28 }
 0x160   :  { %1230 = vst [vmem:[#allocation8 + $0x70] sm:$0xff] %v1166_v26  ;;  %v1104_v25 = vadd.f32 %v1628_v3, %v739_v27  ;;  %v1695_v40 = vpop.f32.mrb[30].mxu0 }
 0x161   :  { %1231 = vst [vmem:[#allocation8 + $0x78] sm:$0xff] %v1167_v22  ;;  %v1105_v31 = vadd.f32 %v1630_v6, %v741_v29  ;;  %v487_v33 = vpop.f32.mrb[18].mxu1  ;;  %v1698_v44 = vpop.f32.mrb[31].mxu0 }
 0x162   :  { %v1168_v36 = vmax.f32 %v1104_v25, 0.0  ;;  %v745_v37 = vadd.f32 %v1651_v42, %v487_v33  ;;  %v489_v38 = vpop.f32.mrb[19].mxu1 }
 0x163   :  { %v1169_v32 = vmax.f32 %v1105_v31, 0.0  ;;  %v747_v39 = vadd.f32 %v1654_v45, %v489_v38 }
 0x164   :  { %1232 = vst [vmem:[#allocation8 + $0x80] sm:$0xff] %v1168_v36  ;;  %v1106_v35 = vadd.f32 %v1628_v3, %v745_v37  ;;  %v1703_v49 = vpop.f32.mrb[32].mxu0 }
 0x165   :  { %1233 = vst [vmem:[#allocation8 + $0x88] sm:$0xff] %v1169_v32  ;;  %v1107_v41 = vadd.f32 %v1630_v6, %v747_v39  ;;  %v493_v43 = vpop.f32.mrb[20].mxu1  ;;  %v1706_v53 = vpop.f32.mrb[33].mxu0 }
 0x166   :  { %v1170_v46 = vmax.f32 %v1106_v35, 0.0  ;;  %v751_v47 = vadd.f32 %v1657_v51, %v493_v43  ;;  %v495_v48 = vpop.f32.mrb[21].mxu1 }
 0x167   :  { %v1171_v42 = vmax.f32 %v1107_v41, 0.0  ;;  %v753_v0 = vadd.f32 %v1660_v54, %v495_v48 }
 0x168   :  { %1234 = vst [vmem:[#allocation8 + $0x90] sm:$0xff] %v1170_v46  ;;  %v1108_v45 = vadd.f32 %v1628_v3, %v751_v47  ;;  %v1711_v59 = vpop.f32.mrb[34].mxu0 }
 0x169   :  { %1235 = vst [vmem:[#allocation8 + $0x98] sm:$0xff] %v1171_v42  ;;  %v1109_v50 = vadd.f32 %v1630_v6, %v753_v0  ;;  %v499_v52 = vpop.f32.mrb[22].mxu1  ;;  %v1714_v63 = vpop.f32.mrb[35].mxu0 }
 0x16a   :  { %v1172_v55 = vmax.f32 %v1108_v45, 0.0  ;;  %v757_v56 = vadd.f32 %v1663_v61, %v499_v52  ;;  %v501_v57 = vpop.f32.mrb[23].mxu1 }
 0x16b   :  { %v1173_v51 = vmax.f32 %v1109_v50, 0.0  ;;  %v759_v58 = vadd.f32 %v1666_v1, %v501_v57 }
 0x16c   :  { %1236 = vst [vmem:[#allocation8 + $0xa0] sm:$0xff] %v1172_v55  ;;  %v1110_v54 = vadd.f32 %v1628_v3, %v757_v56  ;;  %v1719_v4 = vpop.f32.mrb[36].mxu0 }
 0x16d   :  { %1237 = vst [vmem:[#allocation8 + $0xa8] sm:$0xff] %v1173_v51  ;;  %v1111_v60 = vadd.f32 %v1630_v6, %v759_v58  ;;  %v505_v62 = vpop.f32.mrb[24].mxu1  ;;  %v1722_v13 = vpop.f32.mrb[37].mxu0 }
 0x16e   :  { %v1174_v2 = vmax.f32 %v1110_v54, 0.0  ;;  %v763_v5 = vadd.f32 %v1671_v10, %v505_v62  ;;  %v507_v8 = vpop.f32.mrb[25].mxu1 }
 0x16f   :  { %v1175_v61 = vmax.f32 %v1111_v60, 0.0  ;;  %v765_v9 = vadd.f32 %v1674_v14, %v507_v8 }
 0x170   :  { %1238 = vst [vmem:[#allocation8 + $0xb0] sm:$0xff] %v1174_v2  ;;  %v1112_v1 = vadd.f32 %v1628_v3, %v763_v5  ;;  %v1727_v19 = vpop.f32.mrb[38].mxu0 }
 0x171   :  { %1239 = vst [vmem:[#allocation8 + $0xb8] sm:$0xff] %v1175_v61  ;;  %v1113_v7 = vadd.f32 %v1630_v6, %v765_v9  ;;  %v511_v11 = vpop.f32.mrb[26].mxu1  ;;  %v1730_v23 = vpop.f32.mrb[39].mxu0 }
 0x172   :  { %v1176_v16 = vmax.f32 %v1112_v1, 0.0  ;;  %v769_v17 = vadd.f32 %v1679_v20, %v511_v11  ;;  %v513_v18 = vpop.f32.mrb[27].mxu1 }
 0x173   :  { %v1177_v10 = vmax.f32 %v1113_v7, 0.0  ;;  %v771_v12 = vadd.f32 %v1682_v24, %v513_v18 }
 0x174   :  { %1240 = vst [vmem:[#allocation8 + $0xc0] sm:$0xff] %v1176_v16  ;;  %v1114_v14 = vadd.f32 %v1628_v3, %v769_v17  ;;  %v1735_v29 = vpop.f32.mrb[40].mxu0 }
 0x175   :  { %1241 = vst [vmem:[#allocation8 + $0xc8] sm:$0xff] %v1177_v10  ;;  %v1115_v15 = vadd.f32 %v1630_v6, %v771_v12  ;;  %v517_v21 = vpop.f32.mrb[28].mxu1  ;;  %v1738_v33 = vpop.f32.mrb[41].mxu0 }
 0x176   :  { %v1178_v26 = vmax.f32 %v1114_v14, 0.0  ;;  %v775_v27 = vadd.f32 %v1687_v30, %v517_v21  ;;  %v519_v28 = vpop.f32.mrb[29].mxu1 }
 0x177   :  { %v1179_v20 = vmax.f32 %v1115_v15, 0.0  ;;  %v777_v22 = vadd.f32 %v1690_v34, %v519_v28 }
 0x178   :  { %1242 = vst [vmem:[#allocation8 + $0xd0] sm:$0xff] %v1178_v26  ;;  %v1116_v24 = vadd.f32 %v1628_v3, %v775_v27  ;;  %v1743_v39 = vpop.f32.mrb[42].mxu0 }
 0x179   :  { %1243 = vst [vmem:[#allocation8 + $0xd8] sm:$0xff] %v1179_v20  ;;  %v1117_v25 = vadd.f32 %v1630_v6, %v777_v22  ;;  %v523_v31 = vpop.f32.mrb[30].mxu1  ;;  %v1746_v43 = vpop.f32.mrb[43].mxu0 }
 0x17a   :  { %v1180_v36 = vmax.f32 %v1116_v24, 0.0  ;;  %v781_v37 = vadd.f32 %v1695_v40, %v523_v31  ;;  %v525_v38 = vpop.f32.mrb[31].mxu1 }
 0x17b   :  { %v1181_v30 = vmax.f32 %v1117_v25, 0.0  ;;  %v783_v32 = vadd.f32 %v1698_v44, %v525_v38 }
 0x17c   :  { %1244 = vst [vmem:[#allocation8 + $0xe0] sm:$0xff] %v1180_v36  ;;  %v1118_v34 = vadd.f32 %v1628_v3, %v781_v37  ;;  %v1751_v0 = vpop.f32.mrb[44].mxu0 }
 0x17d   :  { %1245 = vst [vmem:[#allocation8 + $0xe8] sm:$0xff] %v1181_v30  ;;  %v1119_v35 = vadd.f32 %v1630_v6, %v783_v32  ;;  %v529_v41 = vpop.f32.mrb[32].mxu1  ;;  %v1754_v52 = vpop.f32.mrb[45].mxu0 }
 0x17e   :  { %v1182_v46 = vmax.f32 %v1118_v34, 0.0  ;;  %v787_v47 = vadd.f32 %v1703_v49, %v529_v41  ;;  %v531_v48 = vpop.f32.mrb[33].mxu1 }
 0x17f   :  { %v1183_v40 = vmax.f32 %v1119_v35, 0.0  ;;  %v789_v42 = vadd.f32 %v1706_v53, %v531_v48 }
 0x180   :  { %1246 = vst [vmem:[#allocation8 + $0xf0] sm:$0xff] %v1182_v46  ;;  %v1120_v44 = vadd.f32 %v1628_v3, %v787_v47  ;;  %v1759_v58 = vpop.f32.mrb[46].mxu0 }
 0x181   :  { %1247 = vst [vmem:[#allocation8 + $0xf8] sm:$0xff] %v1183_v40  ;;  %v1121_v45 = vadd.f32 %v1630_v6, %v789_v42  ;;  %v535_v50 = vpop.f32.mrb[34].mxu1  ;;  %v1762_v62 = vpop.f32.mrb[47].mxu0 }
 0x182   :  { %v1184_v55 = vmax.f32 %v1120_v44, 0.0  ;;  %v793_v56 = vadd.f32 %v1711_v59, %v535_v50  ;;  %v537_v57 = vpop.f32.mrb[35].mxu1 }
 0x183   :  { %v1185_v49 = vmax.f32 %v1121_v45, 0.0  ;;  %v795_v51 = vadd.f32 %v1714_v63, %v537_v57 }
 0x184   :  { %1248 = vst [vmem:[#allocation8 + $0x100] sm:$0xff] %v1184_v55  ;;  %v1122_v53 = vadd.f32 %v1628_v3, %v793_v56  ;;  %v1767_v9 = vpop.f32.mrb[48].mxu0 }
 0x185   :  { %1249 = vst [vmem:[#allocation8 + $0x108] sm:$0xff] %v1185_v49  ;;  %v1123_v54 = vadd.f32 %v1630_v6, %v795_v51  ;;  %v541_v60 = vpop.f32.mrb[36].mxu1  ;;  %v1770_v11 = vpop.f32.mrb[49].mxu0 }
 0x186   :  { %v1186_v2 = vmax.f32 %v1122_v53, 0.0  ;;  %v799_v5 = vadd.f32 %v1719_v4, %v541_v60  ;;  %v543_v8 = vpop.f32.mrb[37].mxu1 }
 0x187   :  { %v1187_v59 = vmax.f32 %v1123_v54, 0.0  ;;  %v801_v61 = vadd.f32 %v1722_v13, %v543_v8 }
 0x188   :  { %1250 = vst [vmem:[#allocation8 + $0x110] sm:$0xff] %v1186_v2  ;;  %v1124_v63 = vadd.f32 %v1628_v3, %v799_v5  ;;  %v1775_v12 = vpop.f32.mrb[50].mxu0 }
 0x189   :  { %1251 = vst [vmem:[#allocation8 + $0x118] sm:$0xff] %v1187_v59  ;;  %v1125_v1 = vadd.f32 %v1630_v6, %v801_v61  ;;  %v547_v7 = vpop.f32.mrb[38].mxu1  ;;  %v1778_v21 = vpop.f32.mrb[51].mxu0 }
 0x18a   :  { %v1188_v16 = vmax.f32 %v1124_v63, 0.0  ;;  %v805_v17 = vadd.f32 %v1727_v19, %v547_v7  ;;  %v549_v18 = vpop.f32.mrb[39].mxu1 }
 0x18b   :  { %v1189_v4 = vmax.f32 %v1125_v1, 0.0  ;;  %v807_v10 = vadd.f32 %v1730_v23, %v549_v18 }
 0x18c   :  { %1252 = vst [vmem:[#allocation8 + $0x120] sm:$0xff] %v1188_v16  ;;  %v1126_v13 = vadd.f32 %v1628_v3, %v805_v17  ;;  %v1783_v22 = vpop.f32.mrb[52].mxu0 }
 0x18d   :  { %1253 = vst [vmem:[#allocation8 + $0x128] sm:$0xff] %v1189_v4  ;;  %v1127_v14 = vadd.f32 %v1630_v6, %v807_v10  ;;  %v553_v15 = vpop.f32.mrb[40].mxu1  ;;  %v1786_v31 = vpop.f32.mrb[53].mxu0 }
 0x18e   :  { %v1190_v26 = vmax.f32 %v1126_v13, 0.0  ;;  %v811_v27 = vadd.f32 %v1735_v29, %v553_v15  ;;  %v555_v28 = vpop.f32.mrb[41].mxu1 }
 0x18f   :  { %v1191_v19 = vmax.f32 %v1127_v14, 0.0  ;;  %v813_v20 = vadd.f32 %v1738_v33, %v555_v28 }
 0x190   :  { %1254 = vst [vmem:[#allocation8 + $0x130] sm:$0xff] %v1190_v26  ;;  %v1128_v23 = vadd.f32 %v1628_v3, %v811_v27  ;;  %v1791_v32 = vpop.f32.mrb[54].mxu0 }
 0x191   :  { %1255 = vst [vmem:[#allocation8 + $0x138] sm:$0xff] %v1191_v19  ;;  %v1129_v24 = vadd.f32 %v1630_v6, %v813_v20  ;;  %v559_v25 = vpop.f32.mrb[42].mxu1  ;;  %v1794_v41 = vpop.f32.mrb[55].mxu0 }
 0x192   :  { %v1192_v36 = vmax.f32 %v1128_v23, 0.0  ;;  %v817_v37 = vadd.f32 %v1743_v39, %v559_v25  ;;  %v561_v38 = vpop.f32.mrb[43].mxu1 }
 0x193   :  { %v1193_v29 = vmax.f32 %v1129_v24, 0.0  ;;  %v819_v30 = vadd.f32 %v1746_v43, %v561_v38 }
 0x194   :  { %1256 = vst [vmem:[#allocation8 + $0x140] sm:$0xff] %v1192_v36  ;;  %v1130_v33 = vadd.f32 %v1628_v3, %v817_v37  ;;  %v858_v42 = vpop.f32.mrb[56].mxu0 }
 0x195   :  { %1257 = vst [vmem:[#allocation8 + $0x148] sm:$0xff] %v1193_v29  ;;  %v1131_v34 = vadd.f32 %v1630_v6, %v819_v30  ;;  %v565_v35 = vpop.f32.mrb[44].mxu1  ;;  %v860_v50 = vpop.f32.mrb[57].mxu0 }
 0x196   :  { %v1194_v46 = vmax.f32 %v1130_v33, 0.0  ;;  %v823_v47 = vadd.f32 %v1751_v0, %v565_v35  ;;  %v567_v48 = vpop.f32.mrb[45].mxu1 }
 0x197   :  { %v1195_v39 = vmax.f32 %v1131_v34, 0.0  ;;  %v825_v40 = vadd.f32 %v1754_v52, %v567_v48 }
 0x198   :  { %1258 = vst [vmem:[#allocation8 + $0x150] sm:$0xff] %v1194_v46  ;;  %v1132_v43 = vadd.f32 %v1628_v3, %v823_v47  ;;  %v864_v52 = vpop.f32.mrb[58].mxu0 }
 0x199   :  { %1259 = vst [vmem:[#allocation8 + $0x158] sm:$0xff] %v1195_v39  ;;  %v1133_v44 = vadd.f32 %v1630_v6, %v825_v40  ;;  %v571_v45 = vpop.f32.mrb[46].mxu1  ;;  %v866_v60 = vpop.f32.mrb[59].mxu0 }
 0x19a   :  { %v1196_v55 = vmax.f32 %v1132_v43, 0.0  ;;  %v829_v56 = vadd.f32 %v1759_v58, %v571_v45  ;;  %v573_v57 = vpop.f32.mrb[47].mxu1 }
 0x19b   :  { %v1197_v49 = vmax.f32 %v1133_v44, 0.0  ;;  %v831_v0 = vadd.f32 %v1762_v62, %v573_v57 }
 0x19c   :  { %1260 = vst [vmem:[#allocation8 + $0x160] sm:$0xff] %v1196_v55  ;;  %v1134_v51 = vadd.f32 %v1628_v3, %v829_v56  ;;  %v870_v62 = vpop.f32.mrb[60].mxu0 }
 0x19d   :  { %1261 = vst [vmem:[#allocation8 + $0x168] sm:$0xff] %v1197_v49  ;;  %v1135_v53 = vadd.f32 %v1630_v6, %v831_v0  ;;  %v577_v54 = vpop.f32.mrb[48].mxu1  ;;  %v872_v7 = vpop.f32.mrb[61].mxu0 }
 0x19e   :  { %v1198_v2 = vmax.f32 %v1134_v51, 0.0  ;;  %v835_v5 = vadd.f32 %v1767_v9, %v577_v54  ;;  %v579_v8 = vpop.f32.mrb[49].mxu1 }
 0x19f   :  { %v1199_v59 = vmax.f32 %v1135_v53, 0.0  ;;  %v837_v58 = vadd.f32 %v1770_v11, %v579_v8 }
 0x1a0   :  { %1262 = vst [vmem:[#allocation8 + $0x170] sm:$0xff] %v1198_v2  ;;  %v1136_v61 = vadd.f32 %v1628_v3, %v835_v5  ;;  %v876_v11 = vpop.f32.mrb[62].mxu0 }
 0x1a1   :  { %1263 = vst [vmem:[#allocation8 + $0x178] sm:$0xff] %v1199_v59  ;;  %v1137_v63 = vadd.f32 %v1630_v6, %v837_v58  ;;  %v583_v1 = vpop.f32.mrb[50].mxu1  ;;  %v878_v15 = vpop.f32.mrb[63].mxu0 }
 0x1a2   :  { %v1200_v16 = vmax.f32 %v1136_v61, 0.0  ;;  %v841_v17 = vadd.f32 %v1775_v12, %v583_v1  ;;  %v585_v18 = vpop.f32.mrb[51].mxu1 }
 0x1a3   :  { %v1201_v4 = vmax.f32 %v1137_v63, 0.0  ;;  %v843_v9 = vadd.f32 %v1778_v21, %v585_v18 }
 0x1a4   :  { %1264 = vst [vmem:[#allocation8 + $0x180] sm:$0xff] %v1200_v16  ;;  %v1138_v10 = vadd.f32 %v1628_v3, %v841_v17 }
 0x1a5   :  { %1265 = vst [vmem:[#allocation8 + $0x188] sm:$0xff] %v1201_v4  ;;  %v1139_v13 = vadd.f32 %v1630_v6, %v843_v9  ;;  %v589_v14 = vpop.f32.mrb[52].mxu1 }
 0x1a6   :  { %v1202_v26 = vmax.f32 %v1138_v10, 0.0  ;;  %v847_v27 = vadd.f32 %v1783_v22, %v589_v14  ;;  %v591_v28 = vpop.f32.mrb[53].mxu1 }
 0x1a7   :  { %v1203_v19 = vmax.f32 %v1139_v13, 0.0  ;;  %v849_v12 = vadd.f32 %v1786_v31, %v591_v28 }
 0x1a8   :  { %1266 = vst [vmem:[#allocation8 + $0x190] sm:$0xff] %v1202_v26  ;;  %v1140_v20 = vadd.f32 %v1628_v3, %v847_v27 }
 0x1a9   :  { %1267 = vst [vmem:[#allocation8 + $0x198] sm:$0xff] %v1203_v19  ;;  %v1141_v21 = vadd.f32 %v1630_v6, %v849_v12  ;;  %v595_v23 = vpop.f32.mrb[54].mxu1 }
 0x1aa   :  { %v1204_v24 = vmax.f32 %v1140_v20, 0.0  ;;  %v853_v25 = vadd.f32 %v1791_v32, %v595_v23  ;;  %v597_v36 = vpop.f32.mrb[55].mxu1 }
 0x1ab   :  { %v1205_v37 = vmax.f32 %v1141_v21, 0.0  ;;  %v855_v38 = vadd.f32 %v1794_v41, %v597_v36 }
 0x1ac   :  { %1268 = vst [vmem:[#allocation8 + $0x1a0] sm:$0xff] %v1204_v24  ;;  %v1142_v22 = vadd.f32 %v1628_v3, %v853_v25 }
 0x1ad   :  { %1269 = vst [vmem:[#allocation8 + $0x1a8] sm:$0xff] %v1205_v37  ;;  %v1143_v31 = vadd.f32 %v1630_v6, %v855_v38  ;;  %v601_v29 = vpop.f32.mrb[56].mxu1 }
 0x1ae   :  { %v1206_v30 = vmax.f32 %v1142_v22, 0.0  ;;  %v859_v33 = vadd.f32 %v858_v42, %v601_v29  ;;  %v603_v34 = vpop.f32.mrb[57].mxu1 }
 0x1af   :  { %v1207_v35 = vmax.f32 %v1143_v31, 0.0  ;;  %v861_v46 = vadd.f32 %v860_v50, %v603_v34 }
 0x1b0   :  { %1270 = vst [vmem:[#allocation8 + $0x1b0] sm:$0xff] %v1206_v30  ;;  %v1144_v47 = vadd.f32 %v1628_v3, %v859_v33 }
 0x1b1   :  { %1271 = vst [vmem:[#allocation8 + $0x1b8] sm:$0xff] %v1207_v35  ;;  %v1145_v32 = vadd.f32 %v1630_v6, %v861_v46  ;;  %v607_v48 = vpop.f32.mrb[58].mxu1 }
 0x1b2   :  { %v1208_v41 = vmax.f32 %v1144_v47, 0.0  ;;  %v865_v39 = vadd.f32 %v864_v52, %v607_v48  ;;  %v609_v40 = vpop.f32.mrb[59].mxu1 }
 0x1b3   :  { %v1209_v43 = vmax.f32 %v1145_v32, 0.0  ;;  %v867_v44 = vadd.f32 %v866_v60, %v609_v40 }
 0x1b4   :  { %1272 = vst [vmem:[#allocation8 + $0x1c0] sm:$0xff] %v1208_v41  ;;  %v1146_v45 = vadd.f32 %v1628_v3, %v865_v39 }
 0x1b5   :  { %1273 = vst [vmem:[#allocation8 + $0x1c8] sm:$0xff] %v1209_v43  ;;  %v1147_v42 = vadd.f32 %v1630_v6, %v867_v44  ;;  %v613_v55 = vpop.f32.mrb[60].mxu1 }
 0x1b6   :  { %v1210_v50 = vmax.f32 %v1146_v45, 0.0  ;;  %v871_v56 = vadd.f32 %v870_v62, %v613_v55  ;;  %v615_v57 = vpop.f32.mrb[61].mxu1 }
 0x1b7   :  { %v1211_v49 = vmax.f32 %v1147_v42, 0.0  ;;  %v873_v0 = vadd.f32 %v872_v7, %v615_v57 }
 0x1b8   :  { %1274 = vst [vmem:[#allocation8 + $0x1d0] sm:$0xff] %v1210_v50  ;;  %v1148_v51 = vadd.f32 %v1628_v3, %v871_v56 }
 0x1b9   :  { %1275 = vst [vmem:[#allocation8 + $0x1d8] sm:$0xff] %v1211_v49  ;;  %v1149_v52 = vadd.f32 %v1630_v6, %v873_v0  ;;  %v619_v53 = vpop.f32.mrb[62].mxu1 }
 0x1ba   :  { %v1212_v54 = vmax.f32 %v1148_v51, 0.0  ;;  %v877_v60 = vadd.f32 %v876_v11, %v619_v53  ;;  %v621_v2 = vpop.f32.mrb[63].mxu1 }
 0x1bb   :  { %v1213_v5 = vmax.f32 %v1149_v52, 0.0  ;;  %v879_v8 = vadd.f32 %v878_v15, %v621_v2 }
 0x1bc   :  { %1276 = vst [vmem:[#allocation8 + $0x1e0] sm:$0xff] %v1212_v54  ;;  %v1150_v59 = vadd.f32 %v1628_v3, %v877_v60 }
 0x1bd   :  { %1277 = vst [vmem:[#allocation8 + $0x1e8] sm:$0xff] %v1213_v5  ;;  %v1151_v58 = vadd.f32 %v1630_v6, %v879_v8 }
 0x1be   :  { %v1214_v61 = vmax.f32 %v1150_v59, 0.0 }
 0x1bf   :  { %v1215_v62 = vmax.f32 %v1151_v58, 0.0 }
 0x1c0   :  { %1278 = vst [vmem:[#allocation8 + $0x1f0] sm:$0xff] %v1214_v61 }
 0x1c1   :  { %1279 = vst [vmem:[#allocation8 + $0x1f8] sm:$0xff] %v1215_v62 }
 0x1c2   :  { %1521 = shalt.err (!%p1518_p6)
}
 0x1c3   :  { %s1522_s17 = scalar_lea.hbm %s1846_s3, 8192 }
 0x1c4   :  { %p1523_p7 = scmp.ne.s32.totalorder %s1846_s3, %s1522_s17  ;;  %p1526_p8 = scmp.lt.u32.totalorder %s1522_s17, %s1846_s3 }
 0x1c6   :  { %p1528_p9 = pnand %p1526_p8, %p1523_p7 }
 0x1c8   :  { %1531 = shalt.err (!%p1528_p9)
}
 0x1c9   :  { %1291 = dma.vmem_to_hbm [thread:$0]  %s1286_s13, 8192, %s1846_s3, [#allocation5], %s1542_s0, %s1542_s0, %s1543_s9  }
 0x1ca   :  { %1536 = dma.done.wait [#allocation5], 8192  }
 0x1cb   :  { %1537 = vsyncadd [#allocation5], 4294959104 }
 0x1cc   :  { %1295 = vsyncpa [#allocation4], 1 }
 0x1cd   :  { %1296 = vsyncpa [#allocation7], 1 }
 0x1ce   :  { %1297 = vsyncpa [#allocation5], 1 }

</bundles_post_ra>
